<compile_context>
chip_gen: v5e
topology: v5e:2x2
jax: 0.10.0
libtpu: 0.0.40
codegen_flags: <defaults>
</compile_context>

<pallas_src>
import functools

import jax
import jax.numpy as jnp
from jax.experimental import pallas as pl
from jax.experimental.pallas import tpu as pltpu

DROPOUT_P = 0.4
EMBED_DIM = 32  # scale = 1


def _ffn_kernel(x_ref, w1_ref, b1_ref, w2_ref, b2_ref, o_ref):
    """One (TM, D) token tile through Linear(4D) -> ReLU -> Linear(D). Eval mode."""
    # bf16 operands straight into the MXU, f32 accumulation.
    h = jnp.dot(x_ref[...], w1_ref[...], preferred_element_type=jnp.float32)
    h = jnp.maximum(h + b1_ref[...], 0.0)                       # f32 elementwise
    y = jnp.dot(h.astype(w2_ref.dtype), w2_ref[...],
                preferred_element_type=jnp.float32) + b2_ref[...]
    o_ref[...] = y.astype(o_ref.dtype)


def _ffn_dropout_kernel(x_ref, w1_ref, b1_ref, w2_ref, b2_ref, bits_ref, o_ref,
                        *, keep_threshold, inv_keep):
    """Training mode: same as above plus inverted dropout from uint32 bits."""
    h = jnp.dot(x_ref[...], w1_ref[...], preferred_element_type=jnp.float32)
    h = jnp.maximum(h + b1_ref[...], 0.0)
    y = jnp.dot(h.astype(w2_ref.dtype), w2_ref[...],
                preferred_element_type=jnp.float32) + b2_ref[...]
    # Integer-threshold dropout: drop iff bits < p * 2^32.
    keep = bits_ref[...] >= jnp.uint32(keep_threshold)
    y = jnp.where(keep, y * inv_keep, 0.0)
    o_ref[...] = y.astype(o_ref.dtype)


def _round_up(a, b):
    return (a + b - 1) // b * b


def feed_forward(x, w1, b1, w2, b2, *, training=False, seed=0,
                 block_rows=512, compute_dtype=jnp.bfloat16):
    """x: (batch, seq, D) float32 -> (batch, seq, D) float32."""
    batch, seq, d = x.shape
    hidden = w1.shape[1]
    assert w1.shape == (d, hidden) and w2.shape == (hidden, d)

    n = batch * seq
    out_dtype = x.dtype

    # Token tiling: every tile is (tm, d) with tm a multiple of 8 (sublanes).
    n_pad = _round_up(n, 8)
    if n_pad <= block_rows:
        tm = n_pad
    else:
        tm = _round_up(block_rows, 8)
        n_pad = _round_up(n, tm)
    grid_m = n_pad // tm

    x2 = x.reshape(n, d).astype(compute_dtype)
    if n_pad != n:
        x2 = jnp.pad(x2, ((0, n_pad - n), (0, 0)))
    w1c = w1.astype(compute_dtype)
    w2c = w2.astype(compute_dtype)
    b1_2d = b1.reshape(1, hidden).astype(jnp.float32)
    b2_2d = b2.reshape(1, d).astype(jnp.float32)

    in_specs = [
        pl.BlockSpec((tm, d), lambda i: (i, 0)),         # activations: tiled over tokens
        pl.BlockSpec((d, hidden), lambda i: (0, 0)),     # weights: resident across grid
        pl.BlockSpec((1, hidden), lambda i: (0, 0)),
        pl.BlockSpec((hidden, d), lambda i: (0, 0)),
        pl.BlockSpec((1, d), lambda i: (0, 0)),
    ]
    operands = [x2, w1c, b1_2d, w2c, b2_2d]

    use_dropout = training and DROPOUT_P > 0.0
    if use_dropout:
        # Deterministic per-token random bits, tiled like the output so every
        # grid step sees distinct dropout masks.
        bits = jax.random.bits(jax.random.PRNGKey(seed), (n_pad, d),
                               dtype=jnp.uint32)
        keep_threshold = min(int(round(DROPOUT_P * 2.0 ** 32)), 2 ** 32 - 1)
        kernel = functools.partial(_ffn_dropout_kernel,
                                   keep_threshold=keep_threshold,
                                   inv_keep=1.0 / (1.0 - DROPOUT_P))
        in_specs.append(pl.BlockSpec((tm, d), lambda i: (i, 0)))
        operands.append(bits)
    else:
        kernel = _ffn_kernel

    bytes_c = jnp.dtype(compute_dtype).itemsize
    bytes_o = jnp.dtype(out_dtype).itemsize
    act_tile_bytes = tm * d * (bytes_c + bytes_o + (4 if use_dropout else 0))
    weight_bytes = 2 * d * hidden * bytes_c + (hidden + d) * 4
    vmem_limit = int(min(96 * 2 ** 20,
                         2 * act_tile_bytes + 2 * weight_bytes + (4 << 20)))

    flops = 4 * n_pad * d * hidden  # two (N,D)x(D,4D)-sized GEMMs
    bytes_accessed = (n_pad * d * (bytes_c + bytes_o)
                      + weight_bytes
                      + (n_pad * d * 4 if use_dropout else 0))

    out = pl.pallas_call(
        kernel,
        out_shape=jax.ShapeDtypeStruct((n_pad, d), out_dtype),
        grid=(grid_m,),
        in_specs=in_specs,
        out_specs=pl.BlockSpec((tm, d), lambda i: (i, 0)),
        compiler_params=pltpu.CompilerParams(
            dimension_semantics=("parallel",),
            vmem_limit_bytes=vmem_limit),
        cost_estimate=pl.CostEstimate(flops=flops, transcendentals=0,
                                      bytes_accessed=int(bytes_accessed)),
    )(*operands)

    return out[:n].reshape(batch, seq, d)


def init_params(key, d):
    """Deterministic params; mimics PyTorch Linear's U(-1/sqrt(fan_in), 1/sqrt(fan_in))."""
    k1, k2, k3, k4 = jax.random.split(key, 4)
    bound1 = 1.0 / jnp.sqrt(d)
    bound2 = 1.0 / jnp.sqrt(4 * d)
    # Stored transposed relative to PyTorch (in_features, out_features) so the
    # kernel computes x @ W directly.
    w1 = jax.random.uniform(k1, (d, 4 * d), jnp.float32, -bound1, bound1)
    b1 = jax.random.uniform(k2, (4 * d,), jnp.float32, -bound1, bound1)
    w2 = jax.random.uniform(k3, (4 * d, d), jnp.float32, -bound2, bound2)
    b2 = jax.random.uniform(k4, (d,), jnp.float32, -bound2, bound2)
    return w1, b1, w2, b2


if __name__ == "__main__":
    key = jax.random.PRNGKey(0)
    kx, kp = jax.random.split(key)

    batch, seq, d = 2, 8, EMBED_DIM
    x = jax.random.normal(kx, (batch, seq, d), jnp.float32)
    w1, b1, w2, b2 = init_params(kp, d)

    # --- eval mode (dropout = identity, matches module.eval()) ---
    y = jax.block_until_ready(feed_forward(x, w1, b1, w2, b2, training=False))
    assert y.shape == (batch, seq, d)

    # Reference with the same bf16-matmul / f32-accumulate numerics as the kernel.
    bf16 = jnp.bfloat16
    x2 = x.reshape(-1, d)
    h_ref = jnp.maximum(
        jnp.dot(x2.astype(bf16), w1.astype(bf16),
                preferred_element_type=jnp.float32) + b1, 0.0)
    y_ref = (jnp.dot(h_ref.astype(bf16), w2.astype(bf16),
                     preferred_element_type=jnp.float32) + b2)
    y_ref = y_ref.reshape(batch, seq, d)
    assert jnp.allclose(y, y_ref, atol=1e-3, rtol=1e-3), \
        float(jnp.max(jnp.abs(y - y_ref)))

    # --- training mode (inverted dropout, deterministic in `seed`) ---
    seed = 123
    y_tr = jax.block_until_ready(
        feed_forward(x, w1, b1, w2, b2, training=True, seed=seed))
    assert y_tr.shape == (batch, seq, d)

    bits = jax.random.bits(jax.random.PRNGKey(seed), (batch * seq, d),
                           dtype=jnp.uint32)
    thresh = jnp.uint32(min(int(round(DROPOUT_P * 2.0 ** 32)), 2 ** 32 - 1))
    keep = (bits >= thresh).reshape(batch, seq, d)
    y_tr_ref = jnp.where(keep, y_ref / (1.0 - DROPOUT_P), 0.0)
    assert jnp.allclose(y_tr, y_tr_ref, atol=1e-3, rtol=1e-3), \
        float(jnp.max(jnp.abs(y_tr - y_tr_ref)))

    print("KERNEL_OK")
</pallas_src>

<mosaic_0001>
module attributes {stable_mosaic.version = 11 : i64} {
  func.func @_ffn_kernel(%arg0: i32, %arg1: memref<16x32xbf16, #tpu.memory_space<vmem>>, %arg2: memref<32x128xbf16, #tpu.memory_space<vmem>>, %arg3: memref<1x128xf32, #tpu.memory_space<vmem>>, %arg4: memref<128x32xbf16, #tpu.memory_space<vmem>>, %arg5: memref<1x32xf32, #tpu.memory_space<vmem>>, %arg6: memref<16x32xf32, #tpu.memory_space<vmem>>) attributes {dimension_semantics = [#tpu.dimension_semantics<parallel>], iteration_bounds = array<i64: 1>, scalar_prefetch = 0 : i64, scratch_operands = 0 : i64, tpu.core_type = #tpu.core_type<tc>, window_params = [{transform_indices = @transform_0, window_bounds = array<i64: 16, 32>}, {pipeline_mode = #tpu.pipeline_mode<synchronous>, transform_indices = @transform_1, window_bounds = array<i64: 32, 128>}, {pipeline_mode = #tpu.pipeline_mode<synchronous>, transform_indices = @transform_2, window_bounds = array<i64: 1, 128>}, {pipeline_mode = #tpu.pipeline_mode<synchronous>, transform_indices = @transform_3, window_bounds = array<i64: 128, 32>}, {pipeline_mode = #tpu.pipeline_mode<synchronous>, transform_indices = @transform_4, window_bounds = array<i64: 1, 32>}, {transform_indices = @transform_5, window_bounds = array<i64: 16, 32>}]} {
    %c0 = arith.constant 0 : index
    %c0_0 = arith.constant 0 : index
    %0 = vector.load %arg1[%c0, %c0_0] : memref<16x32xbf16, #tpu.memory_space<vmem>>, vector<16x32xbf16>
    %c0_1 = arith.constant 0 : index
    %c0_2 = arith.constant 0 : index
    %1 = vector.load %arg2[%c0_1, %c0_2] : memref<32x128xbf16, #tpu.memory_space<vmem>>, vector<32x128xbf16>
    %cst = arith.constant dense<0.000000e+00> : vector<16x128xf32>
    %2 = tpu.matmul %0, %1, %cst {dimension_numbers = #tpu.dot_dimension_numbers<[1], [0], [0], [1], [0, 0, 1, 1], [], []>} : vector<16x32xbf16>, vector<32x128xbf16>, vector<16x128xf32> -> vector<16x128xf32>
    %c0_3 = arith.constant 0 : index
    %c0_4 = arith.constant 0 : index
    %3 = vector.load %arg3[%c0_3, %c0_4] : memref<1x128xf32, #tpu.memory_space<vmem>>, vector<1x128xf32>
    %4 = vector.broadcast %3 : vector<1x128xf32> to vector<16x128xf32>
    %5 = arith.addf %2, %4 : vector<16x128xf32>
    %cst_5 = arith.constant 0.000000e+00 : f32
    %6 = vector.broadcast %cst_5 : f32 to vector<16x128xf32>
    %7 = arith.maximumf %5, %6 : vector<16x128xf32>
    %8 = arith.truncf %7 : vector<16x128xf32> to vector<16x128xbf16>
    %c0_6 = arith.constant 0 : index
    %c0_7 = arith.constant 0 : index
    %9 = vector.load %arg4[%c0_6, %c0_7] : memref<128x32xbf16, #tpu.memory_space<vmem>>, vector<128x32xbf16>
    %cst_8 = arith.constant dense<0.000000e+00> : vector<16x32xf32>
    %10 = tpu.matmul %8, %9, %cst_8 {dimension_numbers = #tpu.dot_dimension_numbers<[1], [0], [0], [1], [0, 0, 1, 1], [], []>} : vector<16x128xbf16>, vector<128x32xbf16>, vector<16x32xf32> -> vector<16x32xf32>
    %c0_9 = arith.constant 0 : index
    %c0_10 = arith.constant 0 : index
    %11 = vector.load %arg5[%c0_9, %c0_10] : memref<1x32xf32, #tpu.memory_space<vmem>>, vector<1x32xf32>
    %12 = vector.broadcast %11 : vector<1x32xf32> to vector<16x32xf32>
    %13 = arith.addf %10, %12 : vector<16x32xf32>
    %c0_11 = arith.constant 0 : index
    %c0_12 = arith.constant 0 : index
    %14 = vector.load %arg6[%c0_11, %c0_12] : memref<16x32xf32, #tpu.memory_space<vmem>>, vector<16x32xf32>
    tpu.vector_store %arg6[%c0_11, %c0_12], %13 {strides = array<i32>} : memref<16x32xf32, #tpu.memory_space<vmem>>, vector<16x32xf32>,
    return
  }
  func.func @transform_0(%arg0: i32) -> (i32, i32) {
    %c0_i32 = arith.constant 0 : i32
    %c0_i32_0 = arith.constant 0 : i32
    return %arg0, %c0_i32 : i32, i32
  }
  func.func @transform_1(%arg0: i32) -> (i32, i32) {
    %c0_i32 = arith.constant 0 : i32
    %c0_i32_0 = arith.constant 0 : i32
    %c0_i32_1 = arith.constant 0 : i32
    return %c0_i32, %c0_i32_0 : i32, i32
  }
  func.func @transform_2(%arg0: i32) -> (i32, i32) {
    %c0_i32 = arith.constant 0 : i32
    %c0_i32_0 = arith.constant 0 : i32
    %c0_i32_1 = arith.constant 0 : i32
    return %c0_i32, %c0_i32_0 : i32, i32
  }
  func.func @transform_3(%arg0: i32) -> (i32, i32) {
    %c0_i32 = arith.constant 0 : i32
    %c0_i32_0 = arith.constant 0 : i32
    %c0_i32_1 = arith.constant 0 : i32
    return %c0_i32, %c0_i32_0 : i32, i32
  }
  func.func @transform_4(%arg0: i32) -> (i32, i32) {
    %c0_i32 = arith.constant 0 : i32
    %c0_i32_0 = arith.constant 0 : i32
    %c0_i32_1 = arith.constant 0 : i32
    return %c0_i32, %c0_i32_0 : i32, i32
  }
  func.func @transform_5(%arg0: i32) -> (i32, i32) {
    %c0_i32 = arith.constant 0 : i32
    %c0_i32_0 = arith.constant 0 : i32
    return %arg0, %c0_i32 : i32, i32
  }
}

</mosaic_0001>

<bundles_post_ra>
// kernel: tpu_custom_call.1
= control target key start
LH: loop header
LB: loop body
LE: loop exit
PB: predicated region body
PF: predicated region fallthrough
CT: control target
= control target key end

     0   :  { %s337_s0 = inlined_call_operand.vmem [shape: bf16[16,32], index: 0, kind: input, shape index: {}]   ;;  %s338_s1 = inlined_call_operand.vmem [shape: bf16[32,128], index: 1, kind: input, shape index: {}]   ;;  %s339_s2 = inlined_call_operand.vmem [shape: f32[1,128], index: 2, kind: input, shape index: {}]   ;;  %s340_s3 = inlined_call_operand.vmem [shape: bf16[128,32], index: 3, kind: input, shape index: {}]   ;;  %s341_s4 = inlined_call_operand.vmem [shape: f32[1,32], index: 4, kind: input, shape index: {}]   ;;  %s342_s5 = inlined_call_operand.hbm [shape: f32[16,32], index: 5, kind: output, shape index: {}]  }
   0x1   :  { %v219_v0 = vld [vmem:[%s338_s1 + $0x8] sm:$0xff]  ;;  %v227_v1 = vld [vmem:[%s340_s3 + $0x38] sm:$0xff]  ;;  %v218_v2 = vld [vmem:[%s338_s1] sm:$0xff] }
   0x2   :  { %59 = vmatpush.bf16.msra.mxu0 %v219_v0  ;;  %138 = vmatpush.bf16.msra.mxu1 %v227_v1  ;;  %v226_v3 = vld [vmem:[%s340_s3 + $0x30] sm:$0xff] }
   0x3   :  { %10 = vsyncpa [#allocation3], 0  ;;  %v217_v4 = vld [vmem:[%s337_s0] sm:$0xff]  ;;  %vm49_vm0 = vcmask 261120   ;;  %v225_v5 = vld [vmem:[%s340_s3 + $0x28] sm:$0xff]  ;;  %s260_s20 = smov 128  }
   0x4   :  { %v224_v6 = vld [vmem:[%s340_s3 + $0x20] sm:$0xff]  ;;  %v223_v7 = vld [vmem:[%s340_s3 + $0x18] sm:$0xff]  ;;  %v222_v8 = vld [vmem:[%s340_s3 + $0x10] sm:$0xff]  ;;  %s261_s21 = smov 8  }
   0x5   :  { %v221_v9 = vld [vmem:[%s340_s3 + $0x8] sm:$0xff]  ;;  %v220_v10 = vld [vmem:[%s340_s3] sm:$0xff]  ;;  %s259_s3 = smov [#allocation2]  }
   0x6   :  { %60 = vmatpush.bf16.msra.mxu0 %v218_v2  ;;  %139 = vmatpush.bf16.msra.mxu1 %v226_v3  ;;  %v231_v12 = vld [vmem:[%s339_s2] ss:$0 sm:$0xff]  ;;  %s158_s17 = sshll.u32 %s259_s3, 4  ;;  %s160_s2 = sshll.u32 %s342_s5, 4  ;;  %s159_s17 = int_to_ptr.vmem [resolvable:$true] %s158_s17  ;;  %s161_s2 = int_to_ptr.hbm [resolvable:$true] %s160_s2 }
   0x7   :  { %v232_v19 = vld [vmem:[%s341_s4] ss:$0 sm:$0xff] }
   0x9   :  { %184 = vmatmul.msk.bf16.vlgmr.msra.gmra.mxu0 %vm49_vm0, %v217_v4 }
   0xa   :  { %140 = vmatpush.bf16.msra.mxu1 %v225_v5 }
   0xe   :  { %141 = vmatpush.bf16.msra.mxu1 %v224_v6 }
  0x12   :  { %142 = vmatpush.bf16.msra.mxu1 %v223_v7 }
  0x16   :  { %143 = vmatpush.bf16.msra.mxu1 %v222_v8 }
  0x1a   :  { %144 = vmatpush.bf16.msra.mxu1 %v221_v9 }
  0x1e   :  { %145 = vmatpush.bf16.msra.mxu1 %v220_v10 }
  0x86   :  { %v62_v11 = vpop.f32.mrf.mxu0 }
  0x87   :  { %v63_v13 = vadd.f32 %v231_v12, %v62_v11 }
  0x89   :  { %v67_v16 = vmax.f32 %v63_v13, 0.0 }
  0x8e   :  { %v64_v14 = vpop.f32.mrf.mxu0 }
  0x8f   :  { %v65_v15 = vadd.f32 %v231_v12, %v64_v14 }
  0x91   :  { %v68_v17 = vmax.f32 %v65_v15, 0.0 }
  0x93   :  { %v69_v18 = vpack.c.bf16 %v68_v17, %v67_v16 }
  0x95   :  { %146 = vmatmul.bf16.vlgmr.msra.gmra.mxu1 %v69_v18 }
 0x112   :  { %v147_v20 = vpop.f32.mrf.mxu1 }
 0x113   :  { %v148_v21 = vadd.f32 %v232_v19, %v147_v20 }
 0x115   :  { %152 = vst.msk [vmem:[#allocation2] sm:$0xff] %vm49_vm0, %v148_v21 }
 0x11a   :  { %v149_v22 = vpop.f32.mrf.mxu1 }
 0x11b   :  { %v150_v23 = vadd.f32 %v232_v19, %v149_v22 }
 0x11d   :  { %153 = vst.msk [vmem:[#allocation2 + $0x8] sm:$0xff] %vm49_vm0, %v150_v23 }
 0x11e   :  { %166 = dma.vmem_to_hbm [thread:$0]  %s159_s17, 256, %s161_s2, [#allocation3], %s260_s20, %s260_s20, %s261_s21  }
 0x11f   :  { %257 = dma.done.wait [#allocation3], 256  }
 0x120   :  { %258 = vsyncadd [#allocation3], 4294967040 }
 0x121   :  { %171 = vsyncpa [#allocation3], 1 }

</bundles_post_ra>
